<compile_context>
chip_gen: v5e
topology: v5e:2x2
jax: 0.10.0
libtpu: 0.0.40
codegen_flags: <defaults>
</compile_context>

<pallas_src>
import functools
import math

import jax
import jax.numpy as jnp
from jax.experimental import pallas as pl
from jax.experimental.pallas import tpu as pltpu


# --------------------------------------------------------------------------
# Fast path: table resident in VMEM, one-hot MXU gather, TB tokens per step.
# --------------------------------------------------------------------------
def _embed_onehot_kernel(ids_ref, table_ref, out_ref, *, scale, vocab_padded):
    # ids_ref:   (TB, 1)       int32   (token ids for this block)
    # table_ref: (V_pad, D)    float32 (resident across the whole grid)
    # out_ref:   (TB, D)       float32
    ids = ids_ref[...]                                            # (TB, 1)
    tb = ids.shape[0]
    iota = jax.lax.broadcasted_iota(jnp.int32, (tb, vocab_padded), 1)
    onehot = (ids == iota).astype(table_ref.dtype)                # (TB, V_pad)
    gathered = jnp.dot(onehot, table_ref[...],
                       preferred_element_type=jnp.float32)        # (TB, D)
    out_ref[...] = (gathered * scale).astype(out_ref.dtype)


# --------------------------------------------------------------------------
# Fallback path (huge vocab that does not fit in VMEM): per-row DMA gather
# driven by scalar-prefetched ids through the BlockSpec index_map.
# --------------------------------------------------------------------------
def _embed_row_kernel(ids_ref, emb_row_ref, out_row_ref, *, scale):
    del ids_ref  # ids only drive the gather through the index_map
    out_row_ref[...] = emb_row_ref[...] * scale


def embedding_forward(ids, table, *, token_block=256,
                      vmem_table_budget_bytes=8 * 1024 * 1024):
    """ids: (B, S) int32, table: (V, D) float32 -> (B, S, D) float32."""
    B, S = ids.shape
    V, D = table.shape
    scale = float(math.sqrt(D))

    flat_ids = jnp.clip(ids.reshape(-1).astype(jnp.int32), 0, V - 1)
    n_tok = B * S

    # Pad vocab to a multiple of 128 so the one-hot matmul is MXU-friendly.
    v_pad = max(128, ((V + 127) // 128) * 128)
    table_bytes = v_pad * D * table.dtype.itemsize

    if table_bytes <= vmem_table_budget_bytes:
        # ---------------- resident-table one-hot MXU gather ----------------
        TB = token_block
        n_pad = ((n_tok + TB - 1) // TB) * TB
        ids_col = jnp.pad(flat_ids, (0, n_pad - n_tok)).reshape(n_pad, 1)
        table_p = jnp.pad(table, ((0, v_pad - V), (0, 0)))

        out_flat = pl.pallas_call(
            functools.partial(_embed_onehot_kernel,
                              scale=scale, vocab_padded=v_pad),
            out_shape=jax.ShapeDtypeStruct((n_pad, D), table.dtype),
            grid=(n_pad // TB,),
            in_specs=[
                # Token-id block for this step (sublane-dense, lane dim = 1
                # equals the full array extent).
                pl.BlockSpec((TB, 1), lambda i: (i, 0)),
                # Whole (padded) table, constant index_map -> stays resident
                # in VMEM across all grid steps.
                pl.BlockSpec((v_pad, D), lambda i: (0, 0)),
            ],
            # Dense (TB, D) output slab per step: full unmasked stores.
            out_specs=pl.BlockSpec((TB, D), lambda i: (i, 0)),
            compiler_params=pltpu.CompilerParams(
                # Disjoint output blocks -> legal to shard across v7x's 2 TCs.
                dimension_semantics=("parallel",),
            ),
        )(ids_col, table_p)

        return out_flat[:n_tok].reshape(B, S, D)

    # ---------------- large-vocab fallback: per-row DMA gather ----------------
    # TODO(synk): a manual double-buffered multi-row DMA gather would be faster
    # here; kept as the simple scalar-prefetch row gather with deeper buffering.
    out_flat = pl.pallas_call(
        functools.partial(_embed_row_kernel, scale=scale),
        out_shape=jax.ShapeDtypeStruct((n_tok, D), table.dtype),
        grid_spec=pltpu.PrefetchScalarGridSpec(
            num_scalar_prefetch=1,
            grid=(n_tok,),
            in_specs=[
                pl.BlockSpec((1, D), lambda i, ids: (ids[i], 0),
                             pipeline_mode=pl.Buffered(4)),
            ],
            out_specs=pl.BlockSpec((1, D), lambda i, ids: (i, 0)),
        ),
        compiler_params=pltpu.CompilerParams(
            dimension_semantics=("arbitrary",),
        ),
    )(flat_ids, table)
    return out_flat.reshape(B, S, D)


def embedding_reference(ids, table):
    D = table.shape[1]
    return jnp.take(table, ids, axis=0) * math.sqrt(D)


if __name__ == "__main__":
    # Small shapes consistent with the module: vocab=32, embed_dim=128,
    # batch=2, seq=8.
    vocab_size = 32
    embed_dim = 128
    B, S = 2, 8

    key = jax.random.PRNGKey(0)
    k_tab, k_ids = jax.random.split(key)

    # nn.Embedding initializes its weight ~ N(0, 1); do the same deterministically.
    table = jax.random.normal(k_tab, (vocab_size, embed_dim), dtype=jnp.float32)
    ids = jax.random.randint(k_ids, (B, S), 0, vocab_size, dtype=jnp.int32)

    out = embedding_forward(ids, table)
    out = jax.block_until_ready(out)

    ref = embedding_reference(ids, table)
    assert out.shape == (B, S, embed_dim)
    assert out.dtype == jnp.float32
    assert jnp.allclose(out, ref, atol=1e-5, rtol=1e-5)

    print("KERNEL_OK")
</pallas_src>

<mosaic_0001>
module attributes {stable_mosaic.version = 11 : i64} {
  func.func @_embed_onehot_kernel(%arg0: i32, %arg1: memref<256x1xi32, #tpu.memory_space<vmem>>, %arg2: memref<128x128xf32, #tpu.memory_space<vmem>>, %arg3: memref<256x128xf32, #tpu.memory_space<vmem>>) attributes {dimension_semantics = [#tpu.dimension_semantics<parallel>], iteration_bounds = array<i64: 1>, scalar_prefetch = 0 : i64, scratch_operands = 0 : i64, tpu.core_type = #tpu.core_type<tc>, window_params = [{transform_indices = @transform_0, window_bounds = array<i64: 256, 1>}, {pipeline_mode = #tpu.pipeline_mode<synchronous>, transform_indices = @transform_1, window_bounds = array<i64: 128, 128>}, {transform_indices = @transform_2, window_bounds = array<i64: 256, 128>}]} {
    %c0 = arith.constant 0 : index
    %c0_0 = arith.constant 0 : index
    %0 = vector.load %arg1[%c0, %c0_0] : memref<256x1xi32, #tpu.memory_space<vmem>>, vector<256x1xi32>
    %1 = tpu.iota {dimensions = array<i32: 1>} : vector<256x128xi32>
    %2 = vector.broadcast %0 : vector<256x1xi32> to vector<256x128xi32>
    %3 = arith.cmpi eq, %2, %1 : vector<256x128xi32>
    %4 = arith.extui %3 : vector<256x128xi1> to vector<256x128xi32>
    %5 = arith.sitofp %4 : vector<256x128xi32> to vector<256x128xf32>
    %c0_1 = arith.constant 0 : index
    %c0_2 = arith.constant 0 : index
    %6 = vector.load %arg2[%c0_1, %c0_2] : memref<128x128xf32, #tpu.memory_space<vmem>>, vector<128x128xf32>
    %cst = arith.constant dense<0.000000e+00> : vector<256x128xf32>
    %7 = tpu.matmul %5, %6, %cst {dimension_numbers = #tpu.dot_dimension_numbers<[1], [0], [0], [1], [0, 0, 1, 1], [], []>} : vector<256x128xf32>, vector<128x128xf32>, vector<256x128xf32> -> vector<256x128xf32>
    %cst_3 = arith.constant 11.3137083 : f32
    %8 = vector.broadcast %cst_3 : f32 to vector<256x128xf32>
    %9 = arith.mulf %7, %8 : vector<256x128xf32>
    %c0_4 = arith.constant 0 : index
    %c0_5 = arith.constant 0 : index
    %10 = vector.load %arg3[%c0_4, %c0_5] : memref<256x128xf32, #tpu.memory_space<vmem>>, vector<256x128xf32>
    tpu.vector_store %arg3[%c0_4, %c0_5], %9 {strides = array<i32>} : memref<256x128xf32, #tpu.memory_space<vmem>>, vector<256x128xf32>,
    return
  }
  func.func @transform_0(%arg0: i32) -> (i32, i32) {
    %c0_i32 = arith.constant 0 : i32
    %c0_i32_0 = arith.constant 0 : i32
    return %arg0, %c0_i32 : i32, i32
  }
  func.func @transform_1(%arg0: i32) -> (i32, i32) {
    %c0_i32 = arith.constant 0 : i32
    %c0_i32_0 = arith.constant 0 : i32
    %c0_i32_1 = arith.constant 0 : i32
    return %c0_i32, %c0_i32_0 : i32, i32
  }
  func.func @transform_2(%arg0: i32) -> (i32, i32) {
    %c0_i32 = arith.constant 0 : i32
    %c0_i32_0 = arith.constant 0 : i32
    return %arg0, %c0_i32 : i32, i32
  }
}

</mosaic_0001>

<bundles_post_ra>
// kernel: tpu_custom_call.1
= control target key start
LH: loop header
LB: loop body
LE: loop exit
PB: predicated region body
PF: predicated region fallthrough
CT: control target
= control target key end

     0   :  { %v595_v3 = vmov 0   ;;  %s828_s0 = inlined_call_operand.vmem [shape: s32[256,1], index: 0, kind: input, shape index: {}]   ;;  %s829_s1 = inlined_call_operand.vmem [shape: f32[128,128], index: 1, kind: input, shape index: {}]   ;;  %s830_s2 = inlined_call_operand.hbm [shape: f32[256,128], index: 2, kind: output, shape index: {}]  }
   0x1   :  { %v29_v0 = vld [vmem:[%s828_s0 + $0x88] sm:$0xff]  ;;  %v28_v1 = vld [vmem:[%s828_s0 + $0x80] sm:$0xff]  ;;  %568 = vset.pattern.permute.xlu2 %v595_v3  ;;  %567 = vset.pattern.permute.xlu1 %v595_v3 }
   0x2   :  { %v12_v2 = vld [vmem:[%s828_s0] sm:$0xff]  ;;  %566 = vset.pattern.permute.xlu0 %v595_v3  ;;  %98 = vperm.xlu2 %568, %v29_v0  }
   0x3   :  { %95 = vperm.xlu0 %566, %v28_v1   ;;  %47 = vperm.xlu1 %567, %v12_v2  }
   0x4   :  { %7 = vsyncpa [#allocation3], 0  ;;  %v37_v4 = vld [vmem:[%s828_s0 + $0xc8] sm:$0xff]  ;;  %v36_v5 = vld [vmem:[%s828_s0 + $0xc0] sm:$0xff]  ;;  %v44_v51 = vlaneseq  ;;  %v596_v56 = vmov 1.0   ;;  %s437_s23 = sshll.u32 %s830_s2, 4  ;;  %s438_s23 = int_to_ptr.hbm [resolvable:$true] %s437_s23 }
   0x5   :  { %v20_v6 = vld [vmem:[%s828_s0 + $0x40] sm:$0xff]  ;;  %v30_v7 = vld [vmem:[%s828_s0 + $0x90] sm:$0xff]  ;;  %v13_v8 = vld [vmem:[%s828_s0 + $0x8] sm:$0xff]  ;;  %s598_s24 = smov 128   ;;  %s599_s25 = smov 8  }
   0x6   :  { %v21_v9 = vld [vmem:[%s828_s0 + $0x48] sm:$0xff]  ;;  %v22_v10 = vld [vmem:[%s828_s0 + $0x50] sm:$0xff]  ;;  %v15_v13 = vld [vmem:[%s828_s0 + $0x18] sm:$0xff]  ;;  %v759_v52 = vand.u32 127, %v44_v51 }
   0x7   :  { %v38_v11 = vld [vmem:[%s828_s0 + $0xd0] sm:$0xff]  ;;  %v31_v14 = vld [vmem:[%s828_s0 + $0x98] sm:$0xff]  ;;  %v40_v16 = vld [vmem:[%s828_s0 + $0xe0] sm:$0xff] }
   0x8   :  { %v14_v12 = vld [vmem:[%s828_s0 + $0x10] sm:$0xff]  ;;  %v39_v15 = vld [vmem:[%s828_s0 + $0xd8] sm:$0xff]  ;;  %v32_v18 = vld [vmem:[%s828_s0 + $0xa0] sm:$0xff] }
   0x9   :  { %v23_v17 = vld [vmem:[%s828_s0 + $0x58] sm:$0xff]  ;;  %v33_v19 = vld [vmem:[%s828_s0 + $0xa8] sm:$0xff]  ;;  %v16_v20 = vld [vmem:[%s828_s0 + $0x20] sm:$0xff] }
   0xa   :  { %122 = vperm.xlu2 %568, %v37_v4   ;;  %v24_v21 = vld [vmem:[%s828_s0 + $0x60] sm:$0xff]  ;;  %v253_v22 = vld [vmem:[%s829_s1 + $0x78] sm:$0xff]  ;;  %v252_v23 = vld [vmem:[%s829_s1 + $0x70] sm:$0xff] }
   0xb   :  { %119 = vperm.xlu0 %566, %v36_v5   ;;  %71 = vperm.xlu1 %567, %v20_v6   ;;  %v251_v24 = vld [vmem:[%s829_s1 + $0x68] sm:$0xff]  ;;  %v250_v28 = vld [vmem:[%s829_s1 + $0x60] sm:$0xff]  ;;  %v249_v29 = vld [vmem:[%s829_s1 + $0x58] sm:$0xff] }
   0xc   :  { %254 = vmatpush.msra.mxu0 %v253_v22  ;;  %514 = vmatpush.msra.mxu2 %v253_v22  ;;  %v25_v25 = vld [vmem:[%s828_s0 + $0x68] sm:$0xff]  ;;  %v18_v30 = vld [vmem:[%s828_s0 + $0x30] sm:$0xff]  ;;  %v246_v35 = vld [vmem:[%s829_s1 + $0x40] sm:$0xff] }
   0xd   :  { %513 = vmatpush.msra.mxu1 %v253_v22  ;;  %515 = vmatpush.msra.mxu3 %v253_v22  ;;  %v41_v26 = vld [vmem:[%s828_s0 + $0xe8] sm:$0xff]  ;;  %v248_v31 = vld [vmem:[%s829_s1 + $0x50] sm:$0xff]  ;;  %v245_v36 = vld [vmem:[%s829_s1 + $0x38] sm:$0xff] }
   0xe   :  { %255 = vmatpush.msra.mxu0 %v252_v23  ;;  %517 = vmatpush.msra.mxu2 %v252_v23  ;;  %v17_v27 = vld [vmem:[%s828_s0 + $0x28] sm:$0xff]  ;;  %v34_v32 = vld [vmem:[%s828_s0 + $0xb0] sm:$0xff]  ;;  %v43_v37 = vld [vmem:[%s828_s0 + $0xf8] sm:$0xff] }
   0xf   :  { %516 = vmatpush.msra.mxu1 %v252_v23  ;;  %518 = vmatpush.msra.mxu3 %v252_v23  ;;  %v42_v33 = vld [vmem:[%s828_s0 + $0xf0] sm:$0xff]  ;;  %v247_v34 = vld [vmem:[%s829_s1 + $0x48] sm:$0xff]  ;;  %v35_v39 = vld [vmem:[%s828_s0 + $0xb8] sm:$0xff] }
  0x10   :  { %256 = vmatpush.msra.mxu0 %v251_v24  ;;  %520 = vmatpush.msra.mxu2 %v251_v24  ;;  %v26_v38 = vld [vmem:[%s828_s0 + $0x70] sm:$0xff]  ;;  %v243_v41 = vld [vmem:[%s829_s1 + $0x28] sm:$0xff]  ;;  %v242_v42 = vld [vmem:[%s829_s1 + $0x20] sm:$0xff] }
  0x11   :  { %519 = vmatpush.msra.mxu1 %v251_v24  ;;  %521 = vmatpush.msra.mxu3 %v251_v24  ;;  %v244_v40 = vld [vmem:[%s829_s1 + $0x30] sm:$0xff]  ;;  %v241_v43 = vld [vmem:[%s829_s1 + $0x18] sm:$0xff]  ;;  %v239_v47 = vld [vmem:[%s829_s1 + $0x8] sm:$0xff] }
  0x12   :  { %101 = vperm.xlu2 %568, %v30_v7   ;;  %257 = vmatpush.msra.mxu0 %v250_v28  ;;  %v19_v44 = vld [vmem:[%s828_s0 + $0x38] sm:$0xff]  ;;  %v240_v46 = vld [vmem:[%s829_s1 + $0x10] sm:$0xff]  ;;  %v238_v48 = vld [vmem:[%s829_s1] sm:$0xff]  ;;  %s597_s1 = smov [#allocation2]  }
  0x13   :  { %50 = vperm.xlu0 %566, %v13_v8   ;;  %74 = vperm.xlu1 %567, %v21_v9   ;;  %v27_v45 = vld [vmem:[%s828_s0 + $0x78] sm:$0xff]  ;;  %s435_s20 = sshll.u32 %s597_s1, 4  ;;  %s436_s20 = int_to_ptr.vmem [resolvable:$true] %s435_s20 }
  0x14   :  { %523 = vmatpush.msra.mxu2 %v250_v28  ;;  %522 = vmatpush.msra.mxu1 %v250_v28 }
  0x15   :  { %524 = vmatpush.msra.mxu3 %v250_v28  ;;  %258 = vmatpush.msra.mxu0 %v249_v29 }
  0x16   :  { %526 = vmatpush.msra.mxu2 %v249_v29  ;;  %525 = vmatpush.msra.mxu1 %v249_v29 }
  0x17   :  { %527 = vmatpush.msra.mxu3 %v249_v29  ;;  %259 = vmatpush.msra.mxu0 %v248_v31 }
  0x18   :  { %529 = vmatpush.msra.mxu2 %v248_v31  ;;  %528 = vmatpush.msra.mxu1 %v248_v31 }
  0x19   :  { %260 = vmatpush.msra.mxu0 %v247_v34  ;;  %530 = vmatpush.msra.mxu3 %v248_v31 }
  0x1a   :  { %77 = vperm.xlu2 %568, %v22_v10   ;;  %532 = vmatpush.msra.mxu2 %v247_v34 }
  0x1b   :  { %125 = vperm.xlu0 %566, %v38_v11   ;;  %53 = vperm.xlu1 %567, %v14_v12  }
  0x1c   :  { %261 = vmatpush.msra.mxu0 %v246_v35  ;;  %531 = vmatpush.msra.mxu1 %v247_v34 }
  0x1d   :  { %533 = vmatpush.msra.mxu3 %v247_v34  ;;  %535 = vmatpush.msra.mxu2 %v246_v35 }
  0x1e   :  { %262 = vmatpush.msra.mxu0 %v245_v36  ;;  %534 = vmatpush.msra.mxu1 %v246_v35 }
  0x1f   :  { %536 = vmatpush.msra.mxu3 %v246_v35  ;;  %538 = vmatpush.msra.mxu2 %v245_v36 }
  0x20   :  { %263 = vmatpush.msra.mxu0 %v244_v40  ;;  %537 = vmatpush.msra.mxu1 %v245_v36 }
  0x21   :  { %541 = vmatpush.msra.mxu2 %v244_v40  ;;  %539 = vmatpush.msra.mxu3 %v245_v36 }
  0x22   :  { %56 = vperm.xlu2 %568, %v15_v13   ;;  %264 = vmatpush.msra.mxu0 %v243_v41 }
  0x23   :  { %104 = vperm.xlu0 %566, %v31_v14   ;;  %128 = vperm.xlu1 %567, %v39_v15  }
  0x24   :  { %544 = vmatpush.msra.mxu2 %v243_v41  ;;  %540 = vmatpush.msra.mxu1 %v244_v40 }
  0x25   :  { %542 = vmatpush.msra.mxu3 %v244_v40  ;;  %265 = vmatpush.msra.mxu0 %v242_v42 }
  0x26   :  { %547 = vmatpush.msra.mxu2 %v242_v42  ;;  %543 = vmatpush.msra.mxu1 %v243_v41 }
  0x27   :  { %545 = vmatpush.msra.mxu3 %v243_v41  ;;  %266 = vmatpush.msra.mxu0 %v241_v43 }
  0x28   :  { %550 = vmatpush.msra.mxu2 %v241_v43  ;;  %546 = vmatpush.msra.mxu1 %v242_v42 }
  0x29   :  { %267 = vmatpush.msra.mxu0 %v240_v46  ;;  %548 = vmatpush.msra.mxu3 %v242_v42 }
  0x2a   :  { %131 = vperm.xlu2 %568, %v40_v16   ;;  %553 = vmatpush.msra.mxu2 %v240_v46 }
  0x2b   :  { %80 = vperm.xlu0 %566, %v23_v17   ;;  %107 = vperm.xlu1 %567, %v32_v18  }
  0x2c   :  { %268 = vmatpush.msra.mxu0 %v239_v47  ;;  %556 = vmatpush.msra.mxu2 %v239_v47 }
  0x2d   :  { %549 = vmatpush.msra.mxu1 %v241_v43  ;;  %551 = vmatpush.msra.mxu3 %v241_v43 }
  0x2e   :  { %269 = vmatpush.msra.mxu0 %v238_v48  ;;  %559 = vmatpush.msra.mxu2 %v238_v48 }
  0x2f   :  { %552 = vmatpush.msra.mxu1 %v240_v46  ;;  %554 = vmatpush.msra.mxu3 %v240_v46 }
  0x31   :  { %555 = vmatpush.msra.mxu1 %v239_v47  ;;  %557 = vmatpush.msra.mxu3 %v239_v47 }
  0x32   :  { %110 = vperm.xlu2 %568, %v33_v19  }
  0x33   :  { %59 = vperm.xlu0 %566, %v16_v20   ;;  %83 = vperm.xlu1 %567, %v24_v21  }
  0x34   :  { %558 = vmatpush.msra.mxu1 %v238_v48  ;;  %560 = vmatpush.msra.mxu3 %v238_v48 }
  0x3a   :  { %86 = vperm.xlu2 %568, %v25_v25  }
  0x3b   :  { %134 = vperm.xlu0 %566, %v41_v26   ;;  %62 = vperm.xlu1 %567, %v17_v27  }
  0x42   :  { %65 = vperm.xlu2 %568, %v18_v30  }
  0x43   :  { %113 = vperm.xlu0 %566, %v34_v32   ;;  %137 = vperm.xlu1 %567, %v42_v33  }
  0x4a   :  { %140 = vperm.xlu2 %568, %v43_v37  }
  0x4b   :  { %89 = vperm.xlu0 %566, %v26_v38   ;;  %116 = vperm.xlu1 %567, %v35_v39  }
  0x53   :  { %68 = vperm.xlu0 %566, %v19_v44   ;;  %92 = vperm.xlu1 %567, %v27_v45  }
  0x5c   :  { %v99_v49 = vpop.permute.xlu2 %98 }
  0x5d   :  { %vm159_vm2 = vcmp.eq.s32.totalorder %v99_v49, %v759_v52 }
  0x64   :  { %v123_v50 = vpop.permute.xlu2 %122 }
  0x65   :  { %vm167_vm7 = vcmp.eq.s32.totalorder %v123_v50, %v759_v52 }
  0x6c   :  { %v102_v55 = vpop.permute.xlu2 %101 }
  0x6d   :  { %vm160_vm8 = vcmp.eq.s32.totalorder %v102_v55, %v759_v52 }
  0x74   :  { %v78_v59 = vpop.permute.xlu2 %77 }
  0x75   :  { %v96_v53 = vpop.permute.xlu0 %95  ;;  %v48_v54 = vpop.permute.xlu1 %47  ;;  %vm152_vm9 = vcmp.eq.s32.totalorder %v78_v59, %v759_v52 }
  0x76   :  { %vm158_vm0 = vcmp.eq.s32.totalorder %v96_v53, %v759_v52  ;;  %vm142_vm1 = vcmp.eq.s32.totalorder %v48_v54, %v759_v52 }
  0x77   :  { %481 = vmatmul.msk.f32.vlgmr.msra.gmra.mxu0 %vm142_vm1, %v596_v56  ;;  %497 = vmatmul.msk.f32.vlgmr.msra.gmra.mxu2 %vm158_vm0, %v596_v56 }
  0x7c   :  { %v57_v62 = vpop.permute.xlu2 %56 }
  0x7d   :  { %v120_v57 = vpop.permute.xlu0 %119  ;;  %v72_v58 = vpop.permute.xlu1 %71  ;;  %vm145_vm12 = vcmp.eq.s32.totalorder %v57_v62, %v759_v52 }
  0x7e   :  { %vm166_vm3 = vcmp.eq.s32.totalorder %v120_v57, %v759_v52  ;;  %vm150_vm4 = vcmp.eq.s32.totalorder %v72_v58, %v759_v52 }
  0x7f   :  { %489 = vmatmul.msk.f32.vlgmr.msra.gmra.mxu1 %vm150_vm4, %v596_v56  ;;  %498 = vmatmul.msk.f32.gmra.mxu2 %vm159_vm2, %v596_v56 }
  0x80   :  { %505 = vmatmul.msk.f32.vlgmr.msra.gmra.mxu3 %vm166_vm3, %v596_v56 }
  0x84   :  { %v132_v1 = vpop.permute.xlu2 %131 }
  0x85   :  { %v51_v60 = vpop.permute.xlu0 %50  ;;  %v75_v61 = vpop.permute.xlu1 %74  ;;  %vm170_vm1 = vcmp.eq.s32.totalorder %v132_v1, %v759_v52 }
  0x86   :  { %vm143_vm5 = vcmp.eq.s32.totalorder %v51_v60, %v759_v52  ;;  %vm151_vm6 = vcmp.eq.s32.totalorder %v75_v61, %v759_v52 }
  0x87   :  { %482 = vmatmul.msk.f32.gmra.mxu0 %vm143_vm5, %v596_v56  ;;  %490 = vmatmul.msk.f32.gmra.mxu1 %vm151_vm6, %v596_v56 }
  0x88   :  { %499 = vmatmul.msk.f32.gmra.mxu2 %vm160_vm8, %v596_v56  ;;  %506 = vmatmul.msk.f32.gmra.mxu3 %vm167_vm7, %v596_v56 }
  0x8c   :  { %v111_v6 = vpop.permute.xlu2 %110 }
  0x8d   :  { %v126_v63 = vpop.permute.xlu0 %125  ;;  %v54_v0 = vpop.permute.xlu1 %53  ;;  %vm163_vm4 = vcmp.eq.s32.totalorder %v111_v6, %v759_v52 }
  0x8e   :  { %vm168_vm10 = vcmp.eq.s32.totalorder %v126_v63, %v759_v52  ;;  %vm144_vm11 = vcmp.eq.s32.totalorder %v54_v0, %v759_v52 }
  0x8f   :  { %483 = vmatmul.msk.f32.gmra.mxu0 %vm144_vm11, %v596_v56  ;;  %491 = vmatmul.msk.f32.gmra.mxu1 %vm152_vm9, %v596_v56 }
  0x90   :  { %507 = vmatmul.msk.f32.gmra.mxu3 %vm168_vm10, %v596_v56 }
  0x94   :  { %v87_v9 = vpop.permute.xlu2 %86 }
  0x95   :  { %v105_v2 = vpop.permute.xlu0 %104  ;;  %v129_v3 = vpop.permute.xlu1 %128  ;;  %vm155_vm5 = vcmp.eq.s32.totalorder %v87_v9, %v759_v52 }
  0x96   :  { %vm161_vm13 = vcmp.eq.s32.totalorder %v105_v2, %v759_v52  ;;  %vm169_vm14 = vcmp.eq.s32.totalorder %v129_v3, %v759_v52 }
  0x97   :  { %484 = vmatmul.msk.f32.gmra.mxu0 %vm145_vm12, %v596_v56  ;;  %500 = vmatmul.msk.f32.gmra.mxu2 %vm161_vm13, %v596_v56 }
  0x98   :  { %508 = vmatmul.msk.f32.gmra.mxu3 %vm169_vm14, %v596_v56 }
  0x9c   :  { %v66_v12 = vpop.permute.xlu2 %65 }
  0x9d   :  { %v81_v4 = vpop.permute.xlu0 %80  ;;  %v108_v5 = vpop.permute.xlu1 %107  ;;  %vm148_vm8 = vcmp.eq.s32.totalorder %v66_v12, %v759_v52 }
  0x9e   :  { %vm153_vm15 = vcmp.eq.s32.totalorder %v81_v4, %v759_v52  ;;  %vm162_vm0 = vcmp.eq.s32.totalorder %v108_v5, %v759_v52 }
  0x9f   :  { %492 = vmatmul.msk.f32.gmra.mxu1 %vm153_vm15, %v596_v56  ;;  %501 = vmatmul.msk.f32.gmra.mxu2 %vm162_vm0, %v596_v56 }
  0xa0   :  { %509 = vmatmul.msk.f32.gmra.mxu3 %vm170_vm1, %v596_v56 }
  0xa4   :  { %v141_v15 = vpop.permute.xlu2 %140 }
  0xa5   :  { %v60_v7 = vpop.permute.xlu0 %59  ;;  %v84_v8 = vpop.permute.xlu1 %83  ;;  %vm173_vm13 = vcmp.eq.s32.totalorder %v141_v15, %v759_v52 }
  0xa6   :  { %vm146_vm2 = vcmp.eq.s32.totalorder %v60_v7, %v759_v52  ;;  %vm154_vm3 = vcmp.eq.s32.totalorder %v84_v8, %v759_v52 }
  0xa7   :  { %485 = vmatmul.msk.f32.gmra.mxu0 %vm146_vm2, %v596_v56  ;;  %493 = vmatmul.msk.f32.gmra.mxu1 %vm154_vm3, %v596_v56 }
  0xa8   :  { %502 = vmatmul.msk.f32.gmra.mxu2 %vm163_vm4, %v596_v56 }
  0xad   :  { %v135_v10 = vpop.permute.xlu0 %134  ;;  %v63_v11 = vpop.permute.xlu1 %62 }
  0xae   :  { %vm171_vm6 = vcmp.eq.s32.totalorder %v135_v10, %v759_v52  ;;  %vm147_vm7 = vcmp.eq.s32.totalorder %v63_v11, %v759_v52 }
  0xaf   :  { %486 = vmatmul.msk.f32.gmra.mxu0 %vm147_vm7, %v596_v56  ;;  %494 = vmatmul.msk.f32.gmra.mxu1 %vm155_vm5, %v596_v56 }
  0xb0   :  { %510 = vmatmul.msk.f32.gmra.mxu3 %vm171_vm6, %v596_v56 }
  0xb5   :  { %v114_v13 = vpop.permute.xlu0 %113  ;;  %v138_v14 = vpop.permute.xlu1 %137 }
  0xb6   :  { %vm164_vm9 = vcmp.eq.s32.totalorder %v114_v13, %v759_v52  ;;  %vm172_vm10 = vcmp.eq.s32.totalorder %v138_v14, %v759_v52 }
  0xb7   :  { %487 = vmatmul.msk.f32.gmra.mxu0 %vm148_vm8, %v596_v56  ;;  %503 = vmatmul.msk.f32.gmra.mxu2 %vm164_vm9, %v596_v56 }
  0xb8   :  { %511 = vmatmul.msk.f32.gmra.mxu3 %vm172_vm10, %v596_v56 }
  0xbd   :  { %v90_v16 = vpop.permute.xlu0 %89  ;;  %v117_v17 = vpop.permute.xlu1 %116 }
  0xbe   :  { %vm156_vm11 = vcmp.eq.s32.totalorder %v90_v16, %v759_v52  ;;  %vm165_vm12 = vcmp.eq.s32.totalorder %v117_v17, %v759_v52 }
  0xbf   :  { %495 = vmatmul.msk.f32.gmra.mxu1 %vm156_vm11, %v596_v56  ;;  %504 = vmatmul.msk.f32.gmra.mxu2 %vm165_vm12, %v596_v56 }
  0xc0   :  { %512 = vmatmul.msk.f32.gmra.mxu3 %vm173_vm13, %v596_v56 }
  0xc5   :  { %v69_v18 = vpop.permute.xlu0 %68  ;;  %v93_v19 = vpop.permute.xlu1 %92 }
  0xc6   :  { %vm149_vm14 = vcmp.eq.s32.totalorder %v69_v18, %v759_v52  ;;  %vm157_vm15 = vcmp.eq.s32.totalorder %v93_v19, %v759_v52 }
  0xc7   :  { %488 = vmatmul.msk.f32.gmra.mxu0 %vm149_vm14, %v596_v56  ;;  %496 = vmatmul.msk.f32.gmra.mxu1 %vm157_vm15, %v596_v56 }
  0xf4   :  { %v271_v20 = vpop.f32.mrf.mxu0 }
  0xf5   :  { %v367_v21 = vmul.f32 11.313708, %v271_v20 }
  0xf7   :  { %399 = vst [vmem:[#allocation2] sm:$0xff] %v367_v21 }
  0xfa   :  { %v319_v22 = vpop.f32.mrf.mxu2 }
  0xfb   :  { %v383_v23 = vmul.f32 11.313708, %v319_v22 }
  0xfc   :  { %v295_v24 = vpop.f32.mrf.mxu1 }
  0xfd   :  { %415 = vst [vmem:[#allocation2 + $0x80] sm:$0xff] %v383_v23  ;;  %v375_v25 = vmul.f32 11.313708, %v295_v24 }
  0xff   :  { %407 = vst [vmem:[#allocation2 + $0x40] sm:$0xff] %v375_v25 }
 0x102   :  { %v322_v26 = vpop.f32.mrf.mxu2 }
 0x103   :  { %v384_v27 = vmul.f32 11.313708, %v322_v26  ;;  %v343_v28 = vpop.f32.mrf.mxu3 }
 0x104   :  { %v391_v29 = vmul.f32 11.313708, %v343_v28  ;;  %v274_v30 = vpop.f32.mrf.mxu0  ;;  %v298_v31 = vpop.f32.mrf.mxu1 }
 0x105   :  { %416 = vst [vmem:[#allocation2 + $0x88] sm:$0xff] %v384_v27  ;;  %v368_v32 = vmul.f32 11.313708, %v274_v30  ;;  %v376_v33 = vmul.f32 11.313708, %v298_v31 }
 0x106   :  { %423 = vst [vmem:[#allocation2 + $0xc0] sm:$0xff] %v391_v29 }
 0x107   :  { %400 = vst [vmem:[#allocation2 + $0x8] sm:$0xff] %v368_v32 }
 0x108   :  { %408 = vst [vmem:[#allocation2 + $0x48] sm:$0xff] %v376_v33 }
 0x10b   :  { %v325_v34 = vpop.f32.mrf.mxu2  ;;  %v346_v35 = vpop.f32.mrf.mxu3 }
 0x10c   :  { %v385_v36 = vmul.f32 11.313708, %v325_v34  ;;  %v392_v37 = vmul.f32 11.313708, %v346_v35  ;;  %v277_v38 = vpop.f32.mrf.mxu0  ;;  %v301_v39 = vpop.f32.mrf.mxu1 }
 0x10d   :  { %v369_v40 = vmul.f32 11.313708, %v277_v38  ;;  %v377_v41 = vmul.f32 11.313708, %v301_v39 }
 0x10e   :  { %417 = vst [vmem:[#allocation2 + $0x90] sm:$0xff] %v385_v36 }
 0x10f   :  { %424 = vst [vmem:[#allocation2 + $0xc8] sm:$0xff] %v392_v37 }
 0x110   :  { %401 = vst [vmem:[#allocation2 + $0x10] sm:$0xff] %v369_v40 }
 0x111   :  { %409 = vst [vmem:[#allocation2 + $0x50] sm:$0xff] %v377_v41 }
 0x113   :  { %v349_v42 = vpop.f32.mrf.mxu3 }
 0x114   :  { %v393_v43 = vmul.f32 11.313708, %v349_v42  ;;  %v280_v44 = vpop.f32.mrf.mxu0 }
 0x115   :  { %v370_v45 = vmul.f32 11.313708, %v280_v44 }
 0x116   :  { %425 = vst [vmem:[#allocation2 + $0xd0] sm:$0xff] %v393_v43 }
 0x117   :  { %402 = vst [vmem:[#allocation2 + $0x18] sm:$0xff] %v370_v45 }
 0x11a   :  { %v328_v46 = vpop.f32.mrf.mxu2 }
 0x11b   :  { %v386_v47 = vmul.f32 11.313708, %v328_v46  ;;  %v352_v48 = vpop.f32.mrf.mxu3 }
 0x11c   :  { %v394_v49 = vmul.f32 11.313708, %v352_v48  ;;  %v304_v50 = vpop.f32.mrf.mxu1 }
 0x11d   :  { %418 = vst [vmem:[#allocation2 + $0x98] sm:$0xff] %v386_v47  ;;  %v378_v51 = vmul.f32 11.313708, %v304_v50 }
 0x11e   :  { %426 = vst [vmem:[#allocation2 + $0xd8] sm:$0xff] %v394_v49 }
 0x11f   :  { %410 = vst [vmem:[#allocation2 + $0x58] sm:$0xff] %v378_v51 }
 0x122   :  { %v331_v52 = vpop.f32.mrf.mxu2 }
 0x123   :  { %v387_v53 = vmul.f32 11.313708, %v331_v52  ;;  %v355_v54 = vpop.f32.mrf.mxu3 }
 0x124   :  { %v395_v55 = vmul.f32 11.313708, %v355_v54  ;;  %v283_v56 = vpop.f32.mrf.mxu0  ;;  %v307_v57 = vpop.f32.mrf.mxu1 }
 0x125   :  { %419 = vst [vmem:[#allocation2 + $0xa0] sm:$0xff] %v387_v53  ;;  %v371_v58 = vmul.f32 11.313708, %v283_v56  ;;  %v379_v59 = vmul.f32 11.313708, %v307_v57 }
 0x126   :  { %427 = vst [vmem:[#allocation2 + $0xe0] sm:$0xff] %v395_v55 }
 0x127   :  { %403 = vst [vmem:[#allocation2 + $0x20] sm:$0xff] %v371_v58 }
 0x128   :  { %411 = vst [vmem:[#allocation2 + $0x60] sm:$0xff] %v379_v59 }
 0x12b   :  { %v334_v60 = vpop.f32.mrf.mxu2 }
 0x12c   :  { %v388_v61 = vmul.f32 11.313708, %v334_v60  ;;  %v286_v62 = vpop.f32.mrf.mxu0  ;;  %v310_v63 = vpop.f32.mrf.mxu1 }
 0x12d   :  { %v372_v0 = vmul.f32 11.313708, %v286_v62  ;;  %v380_v1 = vmul.f32 11.313708, %v310_v63 }
 0x12e   :  { %420 = vst [vmem:[#allocation2 + $0xa8] sm:$0xff] %v388_v61 }
 0x12f   :  { %404 = vst [vmem:[#allocation2 + $0x28] sm:$0xff] %v372_v0 }
 0x130   :  { %412 = vst [vmem:[#allocation2 + $0x68] sm:$0xff] %v380_v1 }
 0x133   :  { %v358_v2 = vpop.f32.mrf.mxu3 }
 0x134   :  { %v396_v3 = vmul.f32 11.313708, %v358_v2  ;;  %v289_v4 = vpop.f32.mrf.mxu0 }
 0x135   :  { %v373_v5 = vmul.f32 11.313708, %v289_v4 }
 0x136   :  { %428 = vst [vmem:[#allocation2 + $0xe8] sm:$0xff] %v396_v3 }
 0x137   :  { %405 = vst [vmem:[#allocation2 + $0x30] sm:$0xff] %v373_v5 }
 0x13a   :  { %v337_v6 = vpop.f32.mrf.mxu2 }
 0x13b   :  { %v389_v7 = vmul.f32 11.313708, %v337_v6  ;;  %v361_v8 = vpop.f32.mrf.mxu3 }
 0x13c   :  { %v397_v9 = vmul.f32 11.313708, %v361_v8  ;;  %v313_v10 = vpop.f32.mrf.mxu1 }
 0x13d   :  { %421 = vst [vmem:[#allocation2 + $0xb0] sm:$0xff] %v389_v7  ;;  %v381_v11 = vmul.f32 11.313708, %v313_v10 }
 0x13e   :  { %429 = vst [vmem:[#allocation2 + $0xf0] sm:$0xff] %v397_v9 }
 0x13f   :  { %413 = vst [vmem:[#allocation2 + $0x70] sm:$0xff] %v381_v11 }
 0x142   :  { %v340_v12 = vpop.f32.mrf.mxu2 }
 0x143   :  { %v390_v13 = vmul.f32 11.313708, %v340_v12  ;;  %v364_v14 = vpop.f32.mrf.mxu3 }
 0x144   :  { %v398_v15 = vmul.f32 11.313708, %v364_v14  ;;  %v292_v16 = vpop.f32.mrf.mxu0  ;;  %v316_v17 = vpop.f32.mrf.mxu1 }
 0x145   :  { %422 = vst [vmem:[#allocation2 + $0xb8] sm:$0xff] %v390_v13  ;;  %v374_v18 = vmul.f32 11.313708, %v292_v16  ;;  %v382_v19 = vmul.f32 11.313708, %v316_v17 }
 0x146   :  { %430 = vst [vmem:[#allocation2 + $0xf8] sm:$0xff] %v398_v15 }
 0x147   :  { %406 = vst [vmem:[#allocation2 + $0x38] sm:$0xff] %v374_v18 }
 0x148   :  { %414 = vst [vmem:[#allocation2 + $0x78] sm:$0xff] %v382_v19 }
 0x149   :  { %443 = dma.vmem_to_hbm [thread:$0]  %s436_s20, 4096, %s438_s23, [#allocation3], %s598_s24, %s598_s24, %s599_s25  }
 0x14a   :  { %593 = dma.done.wait [#allocation3], 4096  }
 0x14b   :  { %594 = vsyncadd [#allocation3], 4294963200 }
 0x14c   :  { %448 = vsyncpa [#allocation3], 1 }

</bundles_post_ra>
